<compile_context>
chip_gen: v7x
topology: tpu7x:2x2x1
jax: 0.10.0
libtpu: 0.0.40
codegen_flags: <defaults>
</compile_context>

<pallas_src>
import functools
import math

import jax
import jax.numpy as jnp
import numpy as np
from jax.experimental import pallas as pl
from jax.experimental.pallas import tpu as pltpu

NEG_INF = -1e30
LN_EPS = 1e-5

# packed-vector row indices inside the (num_layers, 8, P) "vecs" array
ROW_BQKV, ROW_BO = 0, 1
ROW_G1, ROW_BE1 = 2, 3
ROW_B0, ROW_B1 = 4, 5
ROW_G2, ROW_BE2 = 6, 7
NUM_VEC_ROWS = 8


def _layer_norm(x, gamma, beta, eps=LN_EPS):
    mean = jnp.mean(x, axis=-1, keepdims=True)
    var = jnp.mean((x - mean) ** 2, axis=-1, keepdims=True)
    return (x - mean) * jax.lax.rsqrt(var + eps) * gamma + beta


# ---------------------------------------------------------------------------
# Pallas kernel: full encoder stack for ONE batch element.
# grid = (batch, layer); the output block (S, E) is resident across the layer
# axis and carries the activation from layer to layer.
# ---------------------------------------------------------------------------
def encoder_kernel(
    bias_ref,    # (1, S)       additive key-padding bias (0 / -1e30), fp32
    x0_ref,      # (S, E)       embedded + position-encoded input, fp32
    wqkv_ref,    # (E, 3*hd)    fused QKV weight, bf16
    wo_ref,      # (hd, E)      output projection weight, bf16
    w0_ref,      # (E, ff)      FFN weight 0, bf16
    w1_ref,      # (ff, E)      FFN weight 1, bf16
    vecs_ref,    # (8, P)       packed biases / LayerNorm params, fp32
    out_ref,     # (S, E)       resident activation / final output, fp32
    *, num_heads, len_vec, len_embedding, len_ff,
):
    layer = pl.program_id(1)

    @pl.when(layer == 0)
    def _():
        out_ref[...] = x0_ref[...]

    E = len_embedding
    H = num_heads
    dv = len_vec
    hd = H * dv

    x = out_ref[...]                       # (S, E) fp32 activation from prev layer
    key_bias = bias_ref[...]               # (1, S) fp32 additive key-pad mask

    vecs = vecs_ref[...]                   # (8, P) fp32
    b_qkv = vecs[ROW_BQKV:ROW_BQKV + 1, :3 * hd]
    b_o = vecs[ROW_BO:ROW_BO + 1, :E]
    g1 = vecs[ROW_G1:ROW_G1 + 1, :E]
    be1 = vecs[ROW_BE1:ROW_BE1 + 1, :E]
    b0 = vecs[ROW_B0:ROW_B0 + 1, :len_ff]
    b1 = vecs[ROW_B1:ROW_B1 + 1, :E]
    g2 = vecs[ROW_G2:ROW_G2 + 1, :E]
    be2 = vecs[ROW_BE2:ROW_BE2 + 1, :E]

    xb = x.astype(jnp.bfloat16)

    # --- fused Q/K/V projection: one MXU dot with N = 3*hd ---
    qkv = jnp.dot(xb, wqkv_ref[...], preferred_element_type=jnp.float32) + b_qkv

    # --- head-major (H, S, dv) layout, batched attention over heads ---
    q_h = jnp.stack([qkv[:, h * dv:(h + 1) * dv] for h in range(H)],
                    axis=0).astype(jnp.bfloat16)
    k_h = jnp.stack([qkv[:, hd + h * dv:hd + (h + 1) * dv] for h in range(H)],
                    axis=0).astype(jnp.bfloat16)
    v_h = jnp.stack([qkv[:, 2 * hd + h * dv:2 * hd + (h + 1) * dv] for h in range(H)],
                    axis=0).astype(jnp.bfloat16)

    scale = 1.0 / float(np.sqrt(dv))
    scores = jnp.einsum("hqd,hkd->hqk", q_h, k_h,
                        preferred_element_type=jnp.float32) * scale   # (H, S, S)
    scores = scores + key_bias[None, :, :]        # additive key-padding mask (fp32)

    # softmax (fp32 elementwise; divide on the EUP)
    m = jnp.max(scores, axis=-1, keepdims=True)
    e = jnp.exp(scores - m)
    denom = jnp.sum(e, axis=-1, keepdims=True)
    probs = e * pl.reciprocal(denom, approx=True)

    ctx = jnp.einsum("hqk,hkd->hqd", probs.astype(jnp.bfloat16), v_h,
                     preferred_element_type=jnp.float32)               # (H, S, dv)

    # concat heads on the lane axis -> single (hd, E) output projection
    ctx2 = jnp.concatenate([ctx[h] for h in range(H)], axis=-1)        # (S, hd)
    attn = jnp.dot(ctx2.astype(jnp.bfloat16), wo_ref[...],
                   preferred_element_type=jnp.float32) + b_o

    # --- residual + LayerNorm 1 (fp32) ---
    y1 = _layer_norm(attn + x, g1, be1)

    # --- position-wise feed-forward (Linear -> ReLU -> Linear), bf16 dots ---
    hdn = jnp.dot(y1.astype(jnp.bfloat16), w0_ref[...],
                  preferred_element_type=jnp.float32) + b0
    hdn = jnp.maximum(hdn, 0.0)
    ff = jnp.dot(hdn.astype(jnp.bfloat16), w1_ref[...],
                 preferred_element_type=jnp.float32) + b1

    # --- residual + LayerNorm 2 -> next layer's input (stays in VMEM) ---
    out_ref[...] = _layer_norm(ff + y1, g2, be2)


def transformer_encoder_pallas(x0, key_bias, stacked, *, num_heads, len_vec,
                               len_ff):
    B, S, E = x0.shape
    L = stacked["wqkv"].shape[0]
    hd = num_heads * len_vec
    P = stacked["vecs"].shape[-1]

    def wmap(b, l):   # per-layer weight block (shared across batch)
        return (l, 0, 0)

    def bmap(b, l):   # per-batch block (constant across layers)
        return (b, 0, 0)

    in_specs = [
        pl.BlockSpec((None, 1, S), bmap),             # key-pad bias (1, S)
        pl.BlockSpec((None, S, E), bmap),             # x0            (S, E)
        pl.BlockSpec((None, E, 3 * hd), wmap),        # wqkv
        pl.BlockSpec((None, hd, E), wmap),            # wo
        pl.BlockSpec((None, E, len_ff), wmap),        # w0
        pl.BlockSpec((None, len_ff, E), wmap),        # w1
        pl.BlockSpec((None, NUM_VEC_ROWS, P), wmap),  # packed vectors
    ]
    kernel = functools.partial(
        encoder_kernel, num_heads=num_heads, len_vec=len_vec,
        len_embedding=E, len_ff=len_ff)

    return pl.pallas_call(
        kernel,
        out_shape=jax.ShapeDtypeStruct((B, S, E), jnp.float32),
        grid=(B, L),
        in_specs=in_specs,
        out_specs=pl.BlockSpec((None, S, E), bmap),
        compiler_params=pltpu.CompilerParams(
            # batch axis parallel (2nd TensorCore on v7x), layers sequential
            dimension_semantics=("parallel", "arbitrary"),
            vmem_limit_bytes=48 * 1024 * 1024,
        ),
    )(key_bias, x0, stacked["wqkv"], stacked["wo"], stacked["w0"],
      stacked["w1"], stacked["vecs"])


# ---------------------------------------------------------------------------
# Parameter construction (deterministic, synthetic weights)
# ---------------------------------------------------------------------------
def make_positional_encoding(max_len, len_embedding):
    position = np.arange(max_len, dtype=np.float32)[:, None]
    div_term = np.exp(
        np.arange(0, len_embedding, 2, dtype=np.float32)
        * -(math.log(10000.0) / len_embedding))
    pe = np.zeros((max_len, len_embedding), dtype=np.float32)
    pe[:, 0::2] = np.sin(position * div_term)
    pe[:, 1::2] = np.cos(position * div_term)
    return jnp.asarray(pe)


def init_params(key, num_vocab, E, num_layers, num_heads, len_ff, len_vec,
                padding_idx=1, max_len=5000):
    hd = num_heads * len_vec
    P = max(3 * hd, E, len_ff)
    keys = jax.random.split(key, 1 + num_layers)

    emb = jax.random.normal(keys[0], (num_vocab, E), jnp.float32) * 0.1
    emb = emb.at[padding_idx].set(0.0)   # nn.Embedding zeros the padding_idx row

    s = 0.1
    wqkv, wo, w0, w1, vecs = [], [], [], [], []
    for i in range(num_layers):
        ks = jax.random.split(keys[1 + i], 6)
        wq = jax.random.normal(ks[0], (E, hd), jnp.float32) * s
        wk = jax.random.normal(ks[1], (E, hd), jnp.float32) * s
        wv = jax.random.normal(ks[2], (E, hd), jnp.float32) * s
        wqkv.append(jnp.concatenate([wq, wk, wv], axis=-1))     # (E, 3*hd)
        wo.append(jax.random.normal(ks[3], (hd, E), jnp.float32) * s)
        w0.append(jax.random.normal(ks[4], (E, len_ff), jnp.float32) * s)
        w1.append(jax.random.normal(ks[5], (len_ff, E), jnp.float32) * s)
        v = np.zeros((NUM_VEC_ROWS, P), np.float32)   # biases = 0
        v[ROW_G1, :E] = 1.0                           # LayerNorm gammas = 1
        v[ROW_G2, :E] = 1.0
        vecs.append(jnp.asarray(v))

    stacked = {
        "wqkv": jnp.stack(wqkv).astype(jnp.bfloat16),   # MXU-native dtype
        "wo": jnp.stack(wo).astype(jnp.bfloat16),
        "w0": jnp.stack(w0).astype(jnp.bfloat16),
        "w1": jnp.stack(w1).astype(jnp.bfloat16),
        "vecs": jnp.stack(vecs),                        # fp32 (LN params, biases)
    }
    return {"embedding": emb, "pe": make_positional_encoding(max_len, E),
            "stacked": stacked}


# ---------------------------------------------------------------------------
# Full forward pass (embedding gather / pos-enc in JAX, encoder stack in Pallas)
# ---------------------------------------------------------------------------
def transformer_encoder_forward(source_words, params, *, num_heads, len_vec,
                                len_ff):
    B, S = source_words.shape

    # per-batch additive key-padding bias: (B, 1, S); -1e30 on pad keys (fp32)
    pad = (source_words == 0)
    key_bias = jnp.where(pad, NEG_INF, 0.0).astype(jnp.float32)[:, None, :]

    # embedding lookup + positional encoding (dropout = identity in eval)
    x = params["embedding"][source_words] + params["pe"][:S][None, :, :]
    x = x.astype(jnp.float32)

    return transformer_encoder_pallas(
        x, key_bias, params["stacked"],
        num_heads=num_heads, len_vec=len_vec, len_ff=len_ff)


# ---------------------------------------------------------------------------
# Pure-JAX reference (mirrors the PyTorch module semantics) for validation.
# ---------------------------------------------------------------------------
def reference_forward(source_words, params, *, num_heads, len_vec, len_ff):
    B, S = source_words.shape
    E = params["embedding"].shape[1]
    hd = num_heads * len_vec
    pad = (source_words == 0)
    x = params["embedding"][source_words] + params["pe"][:S][None, :, :]
    st = params["stacked"]
    for l in range(st["wqkv"].shape[0]):
        wqkv = st["wqkv"][l].astype(jnp.float32)
        wq, wk, wv = wqkv[:, :hd], wqkv[:, hd:2 * hd], wqkv[:, 2 * hd:]
        wo = st["wo"][l].astype(jnp.float32)
        w0 = st["w0"][l].astype(jnp.float32)
        w1 = st["w1"][l].astype(jnp.float32)
        vv = st["vecs"][l]
        bqkv = vv[ROW_BQKV, :3 * hd]
        bq, bk, bv = bqkv[:hd], bqkv[hd:2 * hd], bqkv[2 * hd:]
        bo, g1, be1 = vv[ROW_BO, :E], vv[ROW_G1, :E], vv[ROW_BE1, :E]
        b0, b1 = vv[ROW_B0, :len_ff], vv[ROW_B1, :E]
        g2, be2 = vv[ROW_G2, :E], vv[ROW_BE2, :E]
        q = (x @ wq + bq).reshape(B, S, num_heads, len_vec).transpose(0, 2, 1, 3)
        k = (x @ wk + bk).reshape(B, S, num_heads, len_vec).transpose(0, 2, 1, 3)
        v = (x @ wv + bv).reshape(B, S, num_heads, len_vec).transpose(0, 2, 1, 3)
        scores = jnp.einsum("bhqd,bhkd->bhqk", q, k) / np.sqrt(len_vec)
        scores = jnp.where(pad[:, None, None, :], -jnp.inf, scores)
        probs = jax.nn.softmax(scores, axis=-1)
        ctx = jnp.einsum("bhqk,bhkd->bhqd", probs, v).transpose(0, 2, 1, 3).reshape(B, S, hd)
        attn = ctx @ wo + bo
        y1 = _layer_norm(attn + x, g1, be1)
        hdn = jax.nn.relu(y1 @ w0 + b0)
        ffo = hdn @ w1 + b1
        x = _layer_norm(ffo + y1, g2, be2)
    return x


# ---------------------------------------------------------------------------
if __name__ == "__main__":
    # module config (small)
    num_vocabularies = 50
    len_embedding = 32
    num_encoder_layers = 2
    num_heads = 4
    len_feedforward = 64
    len_vec = len_embedding // num_heads   # len_vec=0 in __init__ -> E // H

    batch_size = 2
    len_sentence = 8

    key = jax.random.PRNGKey(0)
    pkey, dkey = jax.random.split(key)
    params = init_params(
        pkey, num_vocabularies, len_embedding, num_encoder_layers,
        num_heads, len_feedforward, len_vec, padding_idx=1)

    # deterministic token ids; pad the tail positions (id 0) to exercise the
    # attention mask while keeping real tokens in every row.
    source_words = jax.random.randint(
        dkey, (batch_size, len_sentence), minval=2, maxval=num_vocabularies,
        dtype=jnp.int32)
    source_words = source_words.at[:, -2:].set(0)

    out = transformer_encoder_forward(
        source_words, params, num_heads=num_heads, len_vec=len_vec,
        len_ff=len_feedforward)
    out = jax.block_until_ready(out)

    assert out.shape == (batch_size, len_sentence, len_embedding)
    assert bool(jnp.all(jnp.isfinite(out)))

    ref = reference_forward(
        source_words, params, num_heads=num_heads, len_vec=len_vec,
        len_ff=len_feedforward)
    np.testing.assert_allclose(np.asarray(out), np.asarray(ref),
                               rtol=2e-2, atol=2e-2)
    print("KERNEL_OK")
</pallas_src>

<mosaic_0001>
module attributes {stable_mosaic.version = 11 : i64} {
  func.func @encoder_kernel(%arg0: i32, %arg1: i32, %arg2: memref<1x1x8xf32, #tpu.memory_space<vmem>>, %arg3: memref<1x8x32xf32, #tpu.memory_space<vmem>>, %arg4: memref<1x32x96xbf16, #tpu.memory_space<vmem>>, %arg5: memref<1x32x32xbf16, #tpu.memory_space<vmem>>, %arg6: memref<1x32x64xbf16, #tpu.memory_space<vmem>>, %arg7: memref<1x64x32xbf16, #tpu.memory_space<vmem>>, %arg8: memref<1x8x96xf32, #tpu.memory_space<vmem>>, %arg9: memref<1x8x32xf32, #tpu.memory_space<vmem>>) attributes {dimension_semantics = [#tpu.dimension_semantics<parallel>, #tpu.dimension_semantics<arbitrary>], iteration_bounds = array<i64: 2, 2>, scalar_prefetch = 0 : i64, scratch_operands = 0 : i64, tpu.core_type = #tpu.core_type<tc>, window_params = [{transform_indices = @transform_0, window_bounds = array<i64: 1, 1, 8>}, {transform_indices = @transform_1, window_bounds = array<i64: 1, 8, 32>}, {transform_indices = @transform_2, window_bounds = array<i64: 1, 32, 96>}, {transform_indices = @transform_3, window_bounds = array<i64: 1, 32, 32>}, {transform_indices = @transform_4, window_bounds = array<i64: 1, 32, 64>}, {transform_indices = @transform_5, window_bounds = array<i64: 1, 64, 32>}, {transform_indices = @transform_6, window_bounds = array<i64: 1, 8, 96>}, {transform_indices = @transform_7, window_bounds = array<i64: 1, 8, 32>}]} {
    %c0_i32 = arith.constant 0 : i32
    %0 = arith.cmpi eq, %arg1, %c0_i32 : i32
    %1 = arith.extui %0 : i1 to i32
    %c0_i32_0 = arith.constant 0 : i32
    %2 = arith.cmpi ne, %1, %c0_i32_0 : i32
    scf.if %2 {
      %c0_43 = arith.constant 0 : index
      %c0_44 = arith.constant 0 : index
      %c0_45 = arith.constant 0 : index
      %149 = vector.load %arg3[%c0_43, %c0_44, %c0_45] : memref<1x8x32xf32, #tpu.memory_space<vmem>>, vector<1x8x32xf32>
      %150 = vector.shape_cast %149 : vector<1x8x32xf32> to vector<8x32xf32>
      %c0_46 = arith.constant 0 : index
      %c0_47 = arith.constant 0 : index
      %c0_48 = arith.constant 0 : index
      %151 = vector.load %arg9[%c0_46, %c0_47, %c0_48] : memref<1x8x32xf32, #tpu.memory_space<vmem>>, vector<1x8x32xf32>
      %152 = vector.shape_cast %151 : vector<1x8x32xf32> to vector<8x32xf32>
      %153 = vector.shape_cast %150 : vector<8x32xf32> to vector<1x8x32xf32>
      tpu.vector_store %arg9[%c0_46, %c0_47, %c0_48], %153 {strides = array<i32>} : memref<1x8x32xf32, #tpu.memory_space<vmem>>, vector<1x8x32xf32>,
    } else {
    }
    %c0 = arith.constant 0 : index
    %c0_1 = arith.constant 0 : index
    %c0_2 = arith.constant 0 : index
    %3 = vector.load %arg9[%c0, %c0_1, %c0_2] : memref<1x8x32xf32, #tpu.memory_space<vmem>>, vector<1x8x32xf32>
    %4 = vector.shape_cast %3 : vector<1x8x32xf32> to vector<8x32xf32>
    %c0_3 = arith.constant 0 : index
    %c0_4 = arith.constant 0 : index
    %c0_5 = arith.constant 0 : index
    %5 = vector.load %arg2[%c0_3, %c0_4, %c0_5] : memref<1x1x8xf32, #tpu.memory_space<vmem>>, vector<1x1x8xf32>
    %6 = vector.shape_cast %5 : vector<1x1x8xf32> to vector<1x8xf32>
    %c0_6 = arith.constant 0 : index
    %c0_7 = arith.constant 0 : index
    %c0_8 = arith.constant 0 : index
    %7 = vector.load %arg8[%c0_6, %c0_7, %c0_8] : memref<1x8x96xf32, #tpu.memory_space<vmem>>, vector<1x8x96xf32>
    %8 = vector.shape_cast %7 : vector<1x8x96xf32> to vector<8x96xf32>
    %9 = vector.extract_strided_slice %8 {offsets = [0, 0], sizes = [1, 96], strides = [1, 1]} : vector<8x96xf32> to vector<1x96xf32>
    %10 = vector.extract_strided_slice %8 {offsets = [1, 0], sizes = [1, 32], strides = [1, 1]} : vector<8x96xf32> to vector<1x32xf32>
    %11 = vector.extract_strided_slice %8 {offsets = [2, 0], sizes = [1, 32], strides = [1, 1]} : vector<8x96xf32> to vector<1x32xf32>
    %12 = vector.extract_strided_slice %8 {offsets = [3, 0], sizes = [1, 32], strides = [1, 1]} : vector<8x96xf32> to vector<1x32xf32>
    %13 = vector.extract_strided_slice %8 {offsets = [4, 0], sizes = [1, 64], strides = [1, 1]} : vector<8x96xf32> to vector<1x64xf32>
    %14 = vector.extract_strided_slice %8 {offsets = [5, 0], sizes = [1, 32], strides = [1, 1]} : vector<8x96xf32> to vector<1x32xf32>
    %15 = vector.extract_strided_slice %8 {offsets = [6, 0], sizes = [1, 32], strides = [1, 1]} : vector<8x96xf32> to vector<1x32xf32>
    %16 = vector.extract_strided_slice %8 {offsets = [7, 0], sizes = [1, 32], strides = [1, 1]} : vector<8x96xf32> to vector<1x32xf32>
    %17 = arith.truncf %4 : vector<8x32xf32> to vector<8x32xbf16>
    %c0_9 = arith.constant 0 : index
    %c0_10 = arith.constant 0 : index
    %c0_11 = arith.constant 0 : index
    %18 = vector.load %arg4[%c0_9, %c0_10, %c0_11] : memref<1x32x96xbf16, #tpu.memory_space<vmem>>, vector<1x32x96xbf16>
    %19 = vector.shape_cast %18 : vector<1x32x96xbf16> to vector<32x96xbf16>
    %cst = arith.constant dense<0.000000e+00> : vector<8x96xf32>
    %20 = tpu.matmul %17, %19, %cst {dimension_numbers = #tpu.dot_dimension_numbers<[1], [0], [0], [1], [0, 0, 1, 1], [], []>} : vector<8x32xbf16>, vector<32x96xbf16>, vector<8x96xf32> -> vector<8x96xf32>
    %21 = vector.broadcast %9 : vector<1x96xf32> to vector<8x96xf32>
    %22 = arith.addf %20, %21 : vector<8x96xf32>
    %23 = vector.extract_strided_slice %22 {offsets = [0, 0], sizes = [8, 8], strides = [1, 1]} : vector<8x96xf32> to vector<8x8xf32>
    %24 = vector.extract_strided_slice %22 {offsets = [0, 8], sizes = [8, 8], strides = [1, 1]} : vector<8x96xf32> to vector<8x8xf32>
    %25 = vector.extract_strided_slice %22 {offsets = [0, 16], sizes = [8, 8], strides = [1, 1]} : vector<8x96xf32> to vector<8x8xf32>
    %26 = vector.extract_strided_slice %22 {offsets = [0, 24], sizes = [8, 8], strides = [1, 1]} : vector<8x96xf32> to vector<8x8xf32>
    %27 = vector.shape_cast %23 : vector<8x8xf32> to vector<1x8x8xf32>
    %28 = vector.shape_cast %24 : vector<8x8xf32> to vector<1x8x8xf32>
    %29 = vector.shape_cast %25 : vector<8x8xf32> to vector<1x8x8xf32>
    %30 = vector.shape_cast %26 : vector<8x8xf32> to vector<1x8x8xf32>
    %31 = tpu.concatenate %27, %28, %29, %30 in 0 : vector<1x8x8xf32>, vector<1x8x8xf32>, vector<1x8x8xf32>, vector<1x8x8xf32> -> vector<4x8x8xf32>
    %32 = arith.truncf %31 : vector<4x8x8xf32> to vector<4x8x8xbf16>
    %33 = vector.extract_strided_slice %22 {offsets = [0, 32], sizes = [8, 8], strides = [1, 1]} : vector<8x96xf32> to vector<8x8xf32>
    %34 = vector.extract_strided_slice %22 {offsets = [0, 40], sizes = [8, 8], strides = [1, 1]} : vector<8x96xf32> to vector<8x8xf32>
    %35 = vector.extract_strided_slice %22 {offsets = [0, 48], sizes = [8, 8], strides = [1, 1]} : vector<8x96xf32> to vector<8x8xf32>
    %36 = vector.extract_strided_slice %22 {offsets = [0, 56], sizes = [8, 8], strides = [1, 1]} : vector<8x96xf32> to vector<8x8xf32>
    %37 = vector.shape_cast %33 : vector<8x8xf32> to vector<1x8x8xf32>
    %38 = vector.shape_cast %34 : vector<8x8xf32> to vector<1x8x8xf32>
    %39 = vector.shape_cast %35 : vector<8x8xf32> to vector<1x8x8xf32>
    %40 = vector.shape_cast %36 : vector<8x8xf32> to vector<1x8x8xf32>
    %41 = tpu.concatenate %37, %38, %39, %40 in 0 : vector<1x8x8xf32>, vector<1x8x8xf32>, vector<1x8x8xf32>, vector<1x8x8xf32> -> vector<4x8x8xf32>
    %42 = arith.truncf %41 : vector<4x8x8xf32> to vector<4x8x8xbf16>
    %43 = vector.extract_strided_slice %22 {offsets = [0, 64], sizes = [8, 8], strides = [1, 1]} : vector<8x96xf32> to vector<8x8xf32>
    %44 = vector.extract_strided_slice %22 {offsets = [0, 72], sizes = [8, 8], strides = [1, 1]} : vector<8x96xf32> to vector<8x8xf32>
    %45 = vector.extract_strided_slice %22 {offsets = [0, 80], sizes = [8, 8], strides = [1, 1]} : vector<8x96xf32> to vector<8x8xf32>
    %46 = vector.extract_strided_slice %22 {offsets = [0, 88], sizes = [8, 8], strides = [1, 1]} : vector<8x96xf32> to vector<8x8xf32>
    %47 = vector.shape_cast %43 : vector<8x8xf32> to vector<1x8x8xf32>
    %48 = vector.shape_cast %44 : vector<8x8xf32> to vector<1x8x8xf32>
    %49 = vector.shape_cast %45 : vector<8x8xf32> to vector<1x8x8xf32>
    %50 = vector.shape_cast %46 : vector<8x8xf32> to vector<1x8x8xf32>
    %51 = tpu.concatenate %47, %48, %49, %50 in 0 : vector<1x8x8xf32>, vector<1x8x8xf32>, vector<1x8x8xf32>, vector<1x8x8xf32> -> vector<4x8x8xf32>
    %52 = arith.truncf %51 : vector<4x8x8xf32> to vector<4x8x8xbf16>
    "tpu.trace_start"() <{level = 10 : i32, message = "hqd,hkd->hqk"}> : () -> ()
    %cst_12 = arith.constant dense<0.000000e+00> : vector<4x8x8xf32>
    %53 = tpu.matmul %32, %42, %cst_12 {dimension_numbers = #tpu.dot_dimension_numbers<[2], [2], [1], [1], [0, 0, 0, 1, 1, 1], [0], [0]>} : vector<4x8x8xbf16>, vector<4x8x8xbf16>, vector<4x8x8xf32> -> vector<4x8x8xf32>
    "tpu.trace_stop"() : () -> ()
    %cst_13 = arith.constant 0.353553385 : f32
    %54 = vector.broadcast %cst_13 : f32 to vector<4x8x8xf32>
    %55 = arith.mulf %53, %54 : vector<4x8x8xf32>
    %56 = vector.shape_cast %6 : vector<1x8xf32> to vector<1x1x8xf32>
    %57 = vector.broadcast %56 : vector<1x1x8xf32> to vector<4x8x8xf32>
    %58 = arith.addf %55, %57 : vector<4x8x8xf32>
    %cst_14 = arith.constant dense<0xFF800000> : vector<4x8xf32>
    %59 = vector.multi_reduction <maximumf>, %58, %cst_14 [2] : vector<4x8x8xf32> to vector<4x8xf32>
    %60 = vector.shape_cast %59 : vector<4x8xf32> to vector<4x8x1xf32>
    %61 = vector.broadcast %60 : vector<4x8x1xf32> to vector<4x8x8xf32>
    %62 = arith.subf %58, %61 : vector<4x8x8xf32>
    %63 = math.exp %62 : vector<4x8x8xf32>
    %cst_15 = arith.constant dense<0.000000e+00> : vector<4x8xf32>
    %64 = vector.multi_reduction <add>, %63, %cst_15 [2] : vector<4x8x8xf32> to vector<4x8xf32>
    %65 = vector.shape_cast %64 : vector<4x8xf32> to vector<4x8x1xf32>
    %66 = tpu.reciprocal %65 {approx = true} : vector<4x8x1xf32> -> vector<4x8x1xf32>
    %67 = vector.broadcast %66 : vector<4x8x1xf32> to vector<4x8x8xf32>
    %68 = arith.mulf %63, %67 : vector<4x8x8xf32>
    %69 = arith.truncf %68 : vector<4x8x8xf32> to vector<4x8x8xbf16>
    "tpu.trace_start"() <{level = 10 : i32, message = "hqk,hkd->hqd"}> : () -> ()
    %cst_16 = arith.constant dense<0.000000e+00> : vector<4x8x8xf32>
    %70 = tpu.matmul %69, %52, %cst_16 {dimension_numbers = #tpu.dot_dimension_numbers<[2], [1], [1], [2], [0, 0, 0, 1, 1, 2], [0], [0]>} : vector<4x8x8xbf16>, vector<4x8x8xbf16>, vector<4x8x8xf32> -> vector<4x8x8xf32>
    "tpu.trace_stop"() : () -> ()
    %71 = vector.extract_strided_slice %70 {offsets = [0, 0, 0], sizes = [1, 8, 8], strides = [1, 1, 1]} : vector<4x8x8xf32> to vector<1x8x8xf32>
    %72 = vector.shape_cast %71 : vector<1x8x8xf32> to vector<8x8xf32>
    %73 = vector.extract_strided_slice %70 {offsets = [1, 0, 0], sizes = [1, 8, 8], strides = [1, 1, 1]} : vector<4x8x8xf32> to vector<1x8x8xf32>
    %74 = vector.shape_cast %73 : vector<1x8x8xf32> to vector<8x8xf32>
    %75 = vector.extract_strided_slice %70 {offsets = [2, 0, 0], sizes = [1, 8, 8], strides = [1, 1, 1]} : vector<4x8x8xf32> to vector<1x8x8xf32>
    %76 = vector.shape_cast %75 : vector<1x8x8xf32> to vector<8x8xf32>
    %77 = vector.extract_strided_slice %70 {offsets = [3, 0, 0], sizes = [1, 8, 8], strides = [1, 1, 1]} : vector<4x8x8xf32> to vector<1x8x8xf32>
    %78 = vector.shape_cast %77 : vector<1x8x8xf32> to vector<8x8xf32>
    %79 = tpu.concatenate %72, %74, %76, %78 in 1 : vector<8x8xf32>, vector<8x8xf32>, vector<8x8xf32>, vector<8x8xf32> -> vector<8x32xf32>
    %80 = arith.truncf %79 : vector<8x32xf32> to vector<8x32xbf16>
    %c0_17 = arith.constant 0 : index
    %c0_18 = arith.constant 0 : index
    %c0_19 = arith.constant 0 : index
    %81 = vector.load %arg5[%c0_17, %c0_18, %c0_19] : memref<1x32x32xbf16, #tpu.memory_space<vmem>>, vector<1x32x32xbf16>
    %82 = vector.shape_cast %81 : vector<1x32x32xbf16> to vector<32x32xbf16>
    %cst_20 = arith.constant dense<0.000000e+00> : vector<8x32xf32>
    %83 = tpu.matmul %80, %82, %cst_20 {dimension_numbers = #tpu.dot_dimension_numbers<[1], [0], [0], [1], [0, 0, 1, 1], [], []>} : vector<8x32xbf16>, vector<32x32xbf16>, vector<8x32xf32> -> vector<8x32xf32>
    %84 = vector.broadcast %10 : vector<1x32xf32> to vector<8x32xf32>
    %85 = arith.addf %83, %84 : vector<8x32xf32>
    %86 = arith.addf %85, %4 : vector<8x32xf32>
    %cst_21 = arith.constant dense<0.000000e+00> : vector<8xf32>
    %87 = vector.multi_reduction <add>, %86, %cst_21 [1] : vector<8x32xf32> to vector<8xf32>
    %88 = vector.shape_cast %87 : vector<8xf32> to vector<8x1xf32>
    %cst_22 = arith.constant 3.200000e+01 : f32
    %89 = vector.broadcast %cst_22 : f32 to vector<8x1xf32>
    %90 = arith.divf %88, %89 : vector<8x1xf32>
    %91 = vector.broadcast %90 : vector<8x1xf32> to vector<8x32xf32>
    %92 = arith.subf %86, %91 : vector<8x32xf32>
    %93 = arith.mulf %92, %92 : vector<8x32xf32>
    %cst_23 = arith.constant dense<0.000000e+00> : vector<8xf32>
    %94 = vector.multi_reduction <add>, %93, %cst_23 [1] : vector<8x32xf32> to vector<8xf32>
    %95 = vector.shape_cast %94 : vector<8xf32> to vector<8x1xf32>
    %cst_24 = arith.constant 3.200000e+01 : f32
    %96 = vector.broadcast %cst_24 : f32 to vector<8x1xf32>
    %97 = arith.divf %95, %96 : vector<8x1xf32>
    %98 = vector.broadcast %90 : vector<8x1xf32> to vector<8x32xf32>
    %99 = arith.subf %86, %98 : vector<8x32xf32>
    %cst_25 = arith.constant 9.99999974E-6 : f32
    %100 = vector.broadcast %cst_25 : f32 to vector<8x1xf32>
    %101 = arith.addf %97, %100 : vector<8x1xf32>
    %102 = math.rsqrt %101 : vector<8x1xf32>
    %103 = vector.broadcast %102 : vector<8x1xf32> to vector<8x32xf32>
    %104 = arith.mulf %99, %103 : vector<8x32xf32>
    %105 = vector.broadcast %11 : vector<1x32xf32> to vector<8x32xf32>
    %106 = arith.mulf %104, %105 : vector<8x32xf32>
    %107 = vector.broadcast %12 : vector<1x32xf32> to vector<8x32xf32>
    %108 = arith.addf %106, %107 : vector<8x32xf32>
    %109 = arith.truncf %108 : vector<8x32xf32> to vector<8x32xbf16>
    %c0_26 = arith.constant 0 : index
    %c0_27 = arith.constant 0 : index
    %c0_28 = arith.constant 0 : index
    %110 = vector.load %arg6[%c0_26, %c0_27, %c0_28] : memref<1x32x64xbf16, #tpu.memory_space<vmem>>, vector<1x32x64xbf16>
    %111 = vector.shape_cast %110 : vector<1x32x64xbf16> to vector<32x64xbf16>
    %cst_29 = arith.constant dense<0.000000e+00> : vector<8x64xf32>
    %112 = tpu.matmul %109, %111, %cst_29 {dimension_numbers = #tpu.dot_dimension_numbers<[1], [0], [0], [1], [0, 0, 1, 1], [], []>} : vector<8x32xbf16>, vector<32x64xbf16>, vector<8x64xf32> -> vector<8x64xf32>
    %113 = vector.broadcast %13 : vector<1x64xf32> to vector<8x64xf32>
    %114 = arith.addf %112, %113 : vector<8x64xf32>
    %cst_30 = arith.constant 0.000000e+00 : f32
    %115 = vector.broadcast %cst_30 : f32 to vector<8x64xf32>
    %116 = arith.maximumf %114, %115 : vector<8x64xf32>
    %117 = arith.truncf %116 : vector<8x64xf32> to vector<8x64xbf16>
    %c0_31 = arith.constant 0 : index
    %c0_32 = arith.constant 0 : index
    %c0_33 = arith.constant 0 : index
    %118 = vector.load %arg7[%c0_31, %c0_32, %c0_33] : memref<1x64x32xbf16, #tpu.memory_space<vmem>>, vector<1x64x32xbf16>
    %119 = vector.shape_cast %118 : vector<1x64x32xbf16> to vector<64x32xbf16>
    %cst_34 = arith.constant dense<0.000000e+00> : vector<8x32xf32>
    %120 = tpu.matmul %117, %119, %cst_34 {dimension_numbers = #tpu.dot_dimension_numbers<[1], [0], [0], [1], [0, 0, 1, 1], [], []>} : vector<8x64xbf16>, vector<64x32xbf16>, vector<8x32xf32> -> vector<8x32xf32>
    %121 = vector.broadcast %14 : vector<1x32xf32> to vector<8x32xf32>
    %122 = arith.addf %120, %121 : vector<8x32xf32>
    %123 = arith.addf %122, %108 : vector<8x32xf32>
    %cst_35 = arith.constant dense<0.000000e+00> : vector<8xf32>
    %124 = vector.multi_reduction <add>, %123, %cst_35 [1] : vector<8x32xf32> to vector<8xf32>
    %125 = vector.shape_cast %124 : vector<8xf32> to vector<8x1xf32>
    %cst_36 = arith.constant 3.200000e+01 : f32
    %126 = vector.broadcast %cst_36 : f32 to vector<8x1xf32>
    %127 = arith.divf %125, %126 : vector<8x1xf32>
    %128 = vector.broadcast %127 : vector<8x1xf32> to vector<8x32xf32>
    %129 = arith.subf %123, %128 : vector<8x32xf32>
    %130 = arith.mulf %129, %129 : vector<8x32xf32>
    %cst_37 = arith.constant dense<0.000000e+00> : vector<8xf32>
    %131 = vector.multi_reduction <add>, %130, %cst_37 [1] : vector<8x32xf32> to vector<8xf32>
    %132 = vector.shape_cast %131 : vector<8xf32> to vector<8x1xf32>
    %cst_38 = arith.constant 3.200000e+01 : f32
    %133 = vector.broadcast %cst_38 : f32 to vector<8x1xf32>
    %134 = arith.divf %132, %133 : vector<8x1xf32>
    %135 = vector.broadcast %127 : vector<8x1xf32> to vector<8x32xf32>
    %136 = arith.subf %123, %135 : vector<8x32xf32>
    %cst_39 = arith.constant 9.99999974E-6 : f32
    %137 = vector.broadcast %cst_39 : f32 to vector<8x1xf32>
    %138 = arith.addf %134, %137 : vector<8x1xf32>
    %139 = math.rsqrt %138 : vector<8x1xf32>
    %140 = vector.broadcast %139 : vector<8x1xf32> to vector<8x32xf32>
    %141 = arith.mulf %136, %140 : vector<8x32xf32>
    %142 = vector.broadcast %15 : vector<1x32xf32> to vector<8x32xf32>
    %143 = arith.mulf %141, %142 : vector<8x32xf32>
    %144 = vector.broadcast %16 : vector<1x32xf32> to vector<8x32xf32>
    %145 = arith.addf %143, %144 : vector<8x32xf32>
    %c0_40 = arith.constant 0 : index
    %c0_41 = arith.constant 0 : index
    %c0_42 = arith.constant 0 : index
    %146 = vector.load %arg9[%c0_40, %c0_41, %c0_42] : memref<1x8x32xf32, #tpu.memory_space<vmem>>, vector<1x8x32xf32>
    %147 = vector.shape_cast %146 : vector<1x8x32xf32> to vector<8x32xf32>
    %148 = vector.shape_cast %145 : vector<8x32xf32> to vector<1x8x32xf32>
    tpu.vector_store %arg9[%c0_40, %c0_41, %c0_42], %148 {strides = array<i32>} : memref<1x8x32xf32, #tpu.memory_space<vmem>>, vector<1x8x32xf32>,
    return
  }
  func.func @transform_0(%arg0: i32, %arg1: i32) -> (i32, i32, i32) {
    %c0_i32 = arith.constant 0 : i32
    %c0_i32_0 = arith.constant 0 : i32
    %c0_i32_1 = arith.constant 0 : i32
    return %arg0, %c0_i32, %c0_i32_0 : i32, i32, i32
  }
  func.func @transform_1(%arg0: i32, %arg1: i32) -> (i32, i32, i32) {
    %c0_i32 = arith.constant 0 : i32
    %c0_i32_0 = arith.constant 0 : i32
    %c0_i32_1 = arith.constant 0 : i32
    return %arg0, %c0_i32, %c0_i32_0 : i32, i32, i32
  }
  func.func @transform_2(%arg0: i32, %arg1: i32) -> (i32, i32, i32) {
    %c0_i32 = arith.constant 0 : i32
    %c0_i32_0 = arith.constant 0 : i32
    %c0_i32_1 = arith.constant 0 : i32
    return %arg1, %c0_i32, %c0_i32_0 : i32, i32, i32
  }
  func.func @transform_3(%arg0: i32, %arg1: i32) -> (i32, i32, i32) {
    %c0_i32 = arith.constant 0 : i32
    %c0_i32_0 = arith.constant 0 : i32
    %c0_i32_1 = arith.constant 0 : i32
    return %arg1, %c0_i32, %c0_i32_0 : i32, i32, i32
  }
  func.func @transform_4(%arg0: i32, %arg1: i32) -> (i32, i32, i32) {
    %c0_i32 = arith.constant 0 : i32
    %c0_i32_0 = arith.constant 0 : i32
    %c0_i32_1 = arith.constant 0 : i32
    return %arg1, %c0_i32, %c0_i32_0 : i32, i32, i32
  }
  func.func @transform_5(%arg0: i32, %arg1: i32) -> (i32, i32, i32) {
    %c0_i32 = arith.constant 0 : i32
    %c0_i32_0 = arith.constant 0 : i32
    %c0_i32_1 = arith.constant 0 : i32
    return %arg1, %c0_i32, %c0_i32_0 : i32, i32, i32
  }
  func.func @transform_6(%arg0: i32, %arg1: i32) -> (i32, i32, i32) {
    %c0_i32 = arith.constant 0 : i32
    %c0_i32_0 = arith.constant 0 : i32
    %c0_i32_1 = arith.constant 0 : i32
    return %arg1, %c0_i32, %c0_i32_0 : i32, i32, i32
  }
  func.func @transform_7(%arg0: i32, %arg1: i32) -> (i32, i32, i32) {
    %c0_i32 = arith.constant 0 : i32
    %c0_i32_0 = arith.constant 0 : i32
    %c0_i32_1 = arith.constant 0 : i32
    return %arg0, %c0_i32, %c0_i32_0 : i32, i32, i32
  }
}

</mosaic_0001>

<bundles_post_ra>
// kernel: tpu_custom_call.1
= control target key start
LH: loop header
LB: loop body
LE: loop exit
PB: predicated region body
PF: predicated region fallthrough
CT: control target
= control target key end

     0   :  { %s2335_s0 = inlined_call_operand.hbm [shape: f32[2,1,8], index: 0, kind: input, shape index: {}]   ;;  %s2336_s1 = inlined_call_operand.hbm [shape: f32[2,8,32], index: 1, kind: input, shape index: {}]   ;;  %s2337_s2 = inlined_call_operand.vmem [shape: bf16[2,32,96], index: 2, kind: input, shape index: {}]   ;;  %s2338_s3 = inlined_call_operand.vmem [shape: bf16[2,32,32], index: 3, kind: input, shape index: {}]   ;;  %s2339_s4 = inlined_call_operand.vmem [shape: bf16[2,32,64], index: 4, kind: input, shape index: {}]   ;;  %s2340_s5 = inlined_call_operand.vmem [shape: bf16[2,64,32], index: 5, kind: input, shape index: {}]   ;;  %s2341_s6 = inlined_call_operand.vmem [shape: f32[2,8,96], index: 6, kind: input, shape index: {}]   ;;  %s2342_s7 = inlined_call_operand.hbm [shape: f32[2,8,32], index: 7, kind: output, shape index: {}]  }
   0x1   :  { %2352 = sst [smem:[#allocation20_spill]] %s2335_s0 }
   0x2   :  { %2353 = sst [smem:[#allocation21_spill]] %s2336_s1 }
   0x3   :  { %12 = vsyncpa [#allocation3], 0 }
   0x4   :  { %14 = vsyncpa [#allocation3 + $0x1], 0 }
   0x5   :  { %15 = vsyncpa [#allocation6], 0 }
   0x6   :  { %17 = vsyncpa [#allocation6 + $0x1], 0 }
   0x7   :  { %18 = vsyncpa [#allocation4], 0 }
   0x8   :  { %20 = vsyncpa [#allocation4 + $0x1], 0  ;;  %s1936_s24 = smov 0   ;;  %s1938_s25 = smov 0  }
   0x9   :  { %s1940_s26 = smov 0   ;;  %s1942_s27 = smov 0  }
   0xa   :  { %s1944_s28 = smov 0   ;;  %s1946_s29 = smov 0  }
   0xb   :  { %s1948_s30 = smov 0   ;;  %s1950_s8 = smov 0  }
   0xc LB: > { %2354 = sst [smem:[#allocation11_spill]] %s1853_s24  ;;  %s1431_s9 = sadd.s32 4294967295, %s1881_s8   ;;  %s1881_s8 = sphi %s1950_s8, %s26_s8   ;;  %s1877_s30 = sphi %s1948_s30, %s2387_s30   ;;  %s1873_s29 = sphi %s1946_s29, %s2386_s29   ;;  %s1869_s28 = sphi %s1944_s28, %s2385_s28   ;;  %s1865_s27 = sphi %s1942_s27, %s2384_s27   ;;  %s1861_s26 = sphi %s1940_s26, %s2383_s26   ;;  %s1857_s25 = sphi %s1938_s25, %s2382_s25   ;;  %s1853_s24 = sphi %s1936_s24, %s2381_s24  }
   0xd   : > { %2355 = sst [smem:[#allocation12_spill]] %s1857_s25  ;;  %s1432_s10 = sadd.s32 4294967294, %s1881_s8  }
   0xe   : > { %2356 = sst [smem:[#allocation13_spill]] %s1861_s26  ;;  %s35_s11 = sadd.s32 1, %s1873_s29 }
   0xf   : > { %2357 = sst [smem:[#allocation14_spill]] %s1873_s29  ;;  %s38_s12 = sadd.s32 1, %s1877_s30 }
  0x10   : > { %2358 = sst [smem:[#allocation15_spill]] %s1877_s30  ;;  %p36_p0 = scmp.ge.s32.totalorder %s35_s11, 2 }
  0x11   : > { %s45_s13 = sadd.s32 1, %s1861_s26  ;;  %p52_p1 = scmp.ne.s32.totalorder %s1861_s26, %s1857_s25 }
  0x12   : > { %p53_p2 = scmp.eq.s32.totalorder %s1881_s8, 0  ;;  %s2389_s11 = smov (%p36_p0, %s35_s11), 0 }
  0x13   : > { %2359 = sst [smem:[#allocation16_spill]] %s2389_s11  ;;  %s2391_s12 = smov (!%p36_p0, %s38_s12), %s1877_s30 }
  0x14   : > { %p1987_p3 = por %p53_p2, %p52_p1  ;;  %p58_p4 = scmp.ne.s32.totalorder %s1857_s25, %s1853_s24 }
  0x15   : > { %p40_p5 = scmp.ge.s32.totalorder %s2391_s12, 2  ;;  %p59_p6 = scmp.eq.s32.totalorder %s1431_s9, 0 }
  0x16   : > { %p238_p7 = scmp.eq.s32.totalorder %s1431_s9, 3  ;;  %p244_p8 = scmp.eq.s32.totalorder %s1432_s10, 3 }
  0x17   : > { %s2393_s12 = smov (%p40_p5, %s2391_s12), 0  ;;  %p1995_p9 = por %p59_p6, %p58_p4 }
  0x18   : > { %2361 = sst [smem:[#allocation17_spill]] %s2393_s12  ;;  %p1999_p10 = por %p238_p7, %p52_p1 }
  0x19   : > { %s2362_s15 = scalar_select %p1995_p9, 1, 0 }
  0x1a   : > { %s2363_s16 = scalar_select %p1999_p10, 1, 0 }
  0x1b   : > { %s42_s17 = ssub.s32 %s1877_s30, %s2393_s12  ;;  %p2005_p11 = por %p244_p8, %p58_p4 }
  0x1c   : > { %p43_p12 = scmp.eq.s32.totalorder %s42_s17, 0  ;;  %p1613_p13 = scmp.lt.s32.totalorder %s1881_s8, 4 }
  0x1d   : > { %s2364_s18 = scalar_select %p2005_p11, 1, 0 }
  0x1e   : > { %s2011_s19 = sand.u32 1, %s1861_s26   ;;  %s1435_s21 = sshll.u32 %s1877_s30, 4 }
  0x1f   : > { %2365 = sst [smem:[#allocation18_spill]] %s2364_s18  ;;  %s267_s22 = scalar_lea.vmem [#allocation2], %s2011_s19 }
  0x20   : > { %s2014_s20 = scalar_select %p43_p12, %s1861_s26, %s45_s13  }
  0x21   : > { %s274_s23 = sshll.u32 %s267_s22, 4  ;;  %s2367_s0 = sld [smem:[#allocation20_spill]]  ;;  %s2023_s23 = int_to_ptr.vmem [resolvable:$true] %s274_s23 }
  0x22   : > { %2366 = sst [smem:[#allocation19_spill]] %s2014_s20  ;;  %p2027_p0 = pnand %p1613_p13, %p1987_p3 }
  0x23   : > { %s265_s22 = scalar_lea.sflag [#allocation3], %s2011_s19 }
  0x24   : > { %p1721_p5 = pneg %p2027_p0 }
  0x27   : > { %s2021_s12 = scalar_lea.hbm %s2367_s0, %s1435_s21  ;;  %s1724_s10 = scalar_lea.hbm %s2367_s0, 32 }
  0x28   : > { %s1719_s9 = scalar_lea.hbm %s2021_s12, 16  ;;  %p1725_p3 = scmp.lt.u32.totalorder %s2021_s12, %s2367_s0 }
  0x29   : > { %p1720_p4 = scmp.ne.s32.totalorder %s2021_s12, %s1719_s9  ;;  %p1726_p8 = scmp.lt.u32.totalorder %s1724_s10, %s1719_s9 }
  0x2a   : > { %p1728_p13 = scmp.lt.u32.totalorder %s1719_s9, %s2021_s12 }
  0x2b   : > { %p1722_p6 = pnand %p1721_p5, %p1720_p4  ;;  %p1727_p12 = por %p1726_p8, %p1725_p3 }
  0x2d   : > { %p1723_p7 = pneg %p1722_p6  ;;  %p1729_p1 = por %p1728_p13, %p1727_p12 }
  0x2f   : > { %p1730_p2 = pnand %p1729_p1, %p1723_p7 }
  0x31   : > { %1733 = shalt.err (!%p1730_p2)
}
  0x32   : > { %s1734_s13 = scalar_lea.vmem %s2023_s23, 16  ;;  %s1883_s21 = smov [#allocation2]  }
  0x33   : > { %p1735_p4 = scmp.ne.s32.totalorder %s2023_s23, %s1734_s13  ;;  %s1739_s14 = sshll.u32 %s1883_s21, 4  ;;  %s1740_s14 = int_to_ptr.vmem [resolvable:$false] %s1739_s14 }
  0x34   : > { %s1741_s29 = scalar_lea.vmem %s1740_s14, 32  ;;  %p1742_p10 = scmp.lt.s32.totalorder %s2023_s23, %s1740_s14 }
  0x35   : > { %p1737_p6 = pnand %p1735_p4, %p1721_p5  ;;  %p1743_p3 = scmp.lt.s32.totalorder %s1741_s29, %s1734_s13 }
  0x37   : > { %p1738_p11 = pneg %p1737_p6  ;;  %p1744_p8 = por %p1743_p3, %p1742_p10 }
  0x39   : > { %p1745_p12 = pnand %p1744_p8, %p1738_p11 }
  0x3b   : > { %1748 = shalt.err (!%p1745_p12)
}
  0x3c   : > { %1605 = dma.hbm_to_vmem [thread:$0]  (!%p2027_p0), %s2021_s12, 16, %s2023_s23, %s265_s22  }
  0x3d   : > { %p2369_p1 = scmp.lt.s32.totalorder %s1881_s8, 5  ;;  %p2370_p2 = scmp.ge.s32.totalorder %s1881_s8, 1 }
  0x3e   : > { %s1437_s13 = sshll.u32 %s1877_s30, 7  ;;  %s2372_s9 = sshll.u32 %s2011_s19, 3 }
  0x3f   : > { %p2064_p7 = pnand %p2370_p2, %p2369_p1  ;;  %s285_s10 = scalar_lea.vmem [#allocation5], %s2372_s9 }
  0x40   : > { %s292_s21 = sshll.u32 %s285_s10, 4  ;;  %s2373_s1 = sld [smem:[#allocation21_spill]]  ;;  %s293_s21 = int_to_ptr.vmem [resolvable:$true] %s292_s21 }
  0x41   : > { %s2371_s11 = scalar_select %p2064_p7, 1, 0 }
  0x42   : > { %s282_s12 = scalar_lea.sflag [#allocation6], %s2011_s19 }
  0x46   : > { %s2074_s0 = scalar_lea.hbm %s2373_s1, %s1437_s13  ;;  %s1754_s10 = scalar_lea.hbm %s2373_s1, 256 }
  0x47   : > { %s1749_s23 = scalar_lea.hbm %s2074_s0, 128  ;;  %p1755_p4 = scmp.lt.u32.totalorder %s2074_s0, %s2373_s1 }
  0x48   : > { %p1750_p10 = scmp.ne.s32.totalorder %s2074_s0, %s1749_s23  ;;  %p1756_p6 = scmp.lt.u32.totalorder %s1754_s10, %s1749_s23 }
  0x49   : > { %p1758_p8 = scmp.lt.u32.totalorder %s1749_s23, %s2074_s0 }
  0x4a   : > { %p1752_p11 = pnand %p1750_p10, %p1721_p5  ;;  %p1757_p3 = por %p1756_p6, %p1755_p4 }
  0x4c   : > { %p1753_p13 = pneg %p1752_p11  ;;  %p1759_p12 = por %p1758_p8, %p1757_p3 }
  0x4e   : > { %p1760_p1 = pnand %p1759_p12, %p1753_p13 }
  0x50   : > { %1763 = shalt.err (!%p1760_p1)
}
  0x51   : > { %s1764_s19 = scalar_lea.vmem %s293_s21, 128  ;;  %s1884_s13 = smov [#allocation5]  }
  0x52   : > { %p1765_p2 = scmp.ne.s32.totalorder %s293_s21, %s1764_s19  ;;  %s1769_s29 = sshll.u32 %s1884_s13, 4  ;;  %s1770_s29 = int_to_ptr.vmem [resolvable:$false] %s1769_s29 }
  0x53   : > { %s1771_s22 = scalar_lea.vmem %s1770_s29, 256  ;;  %p1772_p9 = scmp.lt.s32.totalorder %s293_s21, %s1770_s29 }
  0x54   : > { %p1767_p10 = pnand %p1765_p2, %p1721_p5  ;;  %p1773_p7 = scmp.lt.s32.totalorder %s1771_s22, %s1764_s19 }
  0x56   : > { %p1768_p11 = pneg %p1767_p10  ;;  %p1774_p4 = por %p1773_p7, %p1772_p9 }
  0x58   : > { %p1775_p6 = pnand %p1774_p4, %p1768_p11 }
  0x5a   : > { %1778 = shalt.err (!%p1775_p6)
}
  0x5b   : > { %1608 = dma.hbm_to_vmem [thread:$0]  (!%p2027_p0), %s2074_s0, 128, %s293_s21, %s282_s12  }
  0x5c   : > { %p2374_p13 = scmp.ne.s32.totalorder %s2371_s11, 0 }
  0x5d   : > { %s2099_s30 = sand.u32 (!%p2374_p13), 1, %s1857_s25   ;;  %p2375_p5 = scmp.ne.s32.totalorder (!%p2374_p13), %s2362_s15, 0 }
  0x5e   : > { %340 = sbr.rel (%p2374_p13) target bundleno = 2740 (0xab4), region = 48  ;;  %s343_s23 = scalar_lea.sflag (!%p2374_p13), [#allocation3], %s2099_s30 }
  0x65   : > { %1840 = dma.done.wait (%p2375_p5), %s343_s23, 16  }
  0x66   : > { %1842 = vsyncadd (%p2375_p5), %s343_s23, 4294967280  ;;  %s1439_s0 = sshll.u32 %s2099_s30, 3  ;;  %s351_s17 = scalar_lea.sflag [#allocation6], %s2099_s30 }
  0x67   : > { %s354_s11 = scalar_lea.vmem [#allocation5], %s1439_s0 }
  0x68   : > { %1844 = dma.done.wait (%p2375_p5), %s351_s17, 128  }
  0x69   : > { %1846 = vsyncadd (%p2375_p5), %s351_s17, 4294967168  ;;  %p413_p9 = scmp.lt.s32.totalorder %s1865_s27, 1  ;;  %s2136_s19 = scalar_lea.vmem [#allocation7], %s1439_s0 }
  0x6a   : > { %p1450_p0 = scmp.ne.s32.totalorder %s1865_s27, 0 }
  0x6b   : > { %s414_s21 = scalar_select %p413_p9, %s1865_s27, 1 }
  0x6c   : > { %441 = sbr.rel (%p1450_p0) target bundleno = 115 (0x73), region = 60  ;;  %v442_v0 = vld [vmem:[%s354_s11] sm:$0xff] (!%p1450_p0)  ;;  %vm443_vm0 = vcmask (!%p1450_p0), 261120  }
  0x6d   : > { %s1478_s12 = sshll.u32 %s414_s21, 4  ;;  %s1481_s10 = sshll.u32 %s414_s21, 5  ;;  %444 = vst.msk [vmem:[%s2136_s19] sm:$0xff] (!%p1450_p0), %vm443_vm0, %v442_v0 }
  0x6e   : > { %s417_s13 = scalar_lea.vmem %s2337_s2, %s1478_s12  ;;  %s2121_s23 = scalar_lea.vmem %s2338_s3, %s1478_s12 }
  0x6f   : > { %s2126_s15 = scalar_lea.vmem %s2339_s4, %s1478_s12  ;;  %s2131_s26 = scalar_lea.vmem %s2340_s5, %s1481_s10 }
  0x70   : > { %s1449_s25 = sshll.u32 %s414_s21, 3 }
  0x71   : > { %s436_s14 = scalar_lea.vmem %s2341_s6, %s1449_s25 }
  0x73 PF: > { %v1689_v1 = vld [vmem:[%s417_s13] sm:$0xff]   ;;  %v1885_v2 = vmov 0.0   ;;  %v1690_v3 = vld [vmem:[%s417_s13 + $0x8] sm:$0xff]   ;;  %vm1886_vm1 = vmmov 0   ;;  %vm469_vm2 = vcmask 261120   ;;  %v453_v6 = vlaneseq  ;;  %s1887_s1 = smov 104  }
  0x74   : > { %1512 = vmatprep.subr.bf16.mxu0 %v1885_v2  ;;  %1520 = vmatprep.subr.bf16.mxu1 %v1885_v2  ;;  %v2145_v4 = vld [vmem:[%s2136_s19] sm:$0xff]  ;;  %s1888_s24 = smov 120   ;;  %s1889_s25 = smov 112   ;;  %vm530_vm3 = vcmask 64512   ;;  %vm791_vm4 = vcmask 1043456   ;;  %vm992_vm5 = vcmask 130048  }
  0x75   : > { %1513 = vmatpush3.bf16.msra.mxu0 %v1689_v1  ;;  %1516 = vmatprep.mubr.msk.bf16.mxu0 %vm1886_vm1, %v1885_v2  ;;  %v448_v5 = vpack.c.bf16 %v2145_v4, %v2145_v4  ;;  %v2156_v7 = vshrl.u32 %v453_v6, 7  ;;  %v2159_v9 = vld [vmem:[%s436_s14] sm:$0xff]  ;;  %s1890_s27 = smov 96   ;;  %s2376_s18 = scalar_lea.vmem [#allocation2], %s2099_s30  ;;  %vm994_vm6 = vcmask 195584   ;;  %vm1187_vm7 = vcmask 523264  }
  0x76   : > { %1514 = vmatprep.subr.bf16.mxu0 %v1885_v2  ;;  %1522 = vmatprep.mubr.msk.bf16.mxu1 %vm1886_vm1, %v1885_v2  ;;  %v1458_v32 = vld [vmem:[%s2376_s18] ss:$0 sm:$0xff]  ;;  %s1891_s20 = smov 64   ;;  %s1892_s9 = smov 8  }
  0x77   : > { %v455_v8 = vsub.s32 0, %v2156_v7  ;;  %s1893_s0 = smov 16   ;;  %s1894_s11 = smov 24  }
  0x78   : > { %s1270_s21 = sshll.u32 %s2136_s19, 4  ;;  %s1257_s29 = scalar_lea.sflag [#allocation4], %s2099_s30  ;;  %s2281_s21 = int_to_ptr.vmem [resolvable:$true] %s1270_s21 }
  0x79   : > { %1515 = vmatpush3.bf16.msra.mxu0 %v1690_v3  ;;  %v456_v10 = vrot.slane %v2159_v9, %v455_v8  ;;  %s1779_s22 = scalar_lea.vmem %s2281_s21, 128  ;;  %p2377_p3 = scmp.ne.s32.totalorder %s2363_s16, 0 }
  0x7a   : > { %1526 = vmatprep.subr.bf16.mxu0 %v1885_v2  ;;  %p1780_p7 = scmp.ne.s32.totalorder %s2281_s21, %s1779_s22 }
  0x7c   : > { %1517 = vmatmul.mubr.msk.bf16.vlgmr.msra.gmra.mrb[0].mxu0 %vm469_vm2, %v448_v5  ;;  %p1781_p8 = pnand %p1780_p7, %p2377_p3 }
  0x7d   : > { %1528 = vmatprep.mubr.msk.bf16.mxu0 %vm1886_vm1, %v1885_v2 }
  0x7e   : > { %p1782_p12 = pneg %p1781_p8 }
 0x14f   : > { %v507_v11 = vpop.f32.mrb[0].mxu0 }
 0x150   : > { %v508_v12 = vadd.f32 %v507_v11, %v456_v10  ;;  %v1518_v13 = vpop.f32.mrb[1].mxu0 }
 0x151   : > { %v510_v14 = vpop.f32.mrb[2].mxu0 }
 0x152   : > { %520 = vrot.lane.b32.xlu1 %v508_v12, %s1887_s1  ;;  %514 = vrot.lane.b32.xlu0 %v508_v12, %s1888_s24  ;;  %v1519_v15 = vpop.f32.mrb[3].mxu0  ;;  %v2162_v16 = vpack.c.bf16 %v508_v12, %v508_v12 }
 0x156   : > { %517 = vrot.lane.b32.xlu0 %v508_v12, %s1889_s25  ;;  %528 = vrot.lane.b32.xlu1 %v2162_v16, %s1890_s27 }
 0x1c4   : > { %v521_v17 = vpop.permute.xlu1 %520  ;;  %v515_v18 = vpop.permute.xlu0 %514 }
 0x1c5   : > { %v2165_v19 = vpack.c.bf16 %v515_v18, %v515_v18  ;;  %v2168_v22 = vpack.c.bf16 %v521_v17, %v521_v17 }
 0x1c7   : > { %578 = vrot.lane.b32.xlu0 %v2165_v19, %s1890_s27 }
 0x1c8   : > { %v518_v20 = vpop.permute.xlu0 %517  ;;  %v529_v21 = vpop.permute.xlu1 %528 }
 0x1c9   : > { %v2170_v23 = vpack.c.bf16 %v518_v20, %v518_v20  ;;  %v535_v24 = vsel %vm530_vm3, %v529_v21, 0 }
 0x1ca   : > { %1521 = vmatpush3.bf16.xpose.msra.mxu1 %v535_v24 }
 0x1cb   : > { %676 = vrot.lane.b32.xlu0 %v2168_v22, %s1890_s27  ;;  %627 = vrot.lane.b32.xlu1 %v2170_v23, %s1890_s27 }
 0x1cc   : > { %1532 = vmatprep.subr.bf16.mxu1 %v1885_v2 }
 0x1d1   : > { %1523 = vmatmul.mubr.msk.bf16.vlgmr.msra.gmra.mrb[0].mxu1 %vm530_vm3, %v2162_v16 }
 0x1d2   : > { %1534 = vmatprep.mubr.msk.bf16.mxu1 %vm1886_vm1, %v1885_v2 }
 0x239   : > { %v579_v25 = vpop.permute.xlu0 %578 }
 0x23a   : > { %v584_v26 = vsel %vm530_vm3, %v579_v25, 0 }
 0x23b   : > { %1527 = vmatpush3.bf16.xpose.msra.mxu0 %v584_v26 }
 0x23c   : > { %1538 = vmatprep.subr.bf16.mxu0 %v1885_v2 }
 0x23d   : > { %v628_v27 = vpop.permute.xlu1 %627  ;;  %v677_v29 = vpop.permute.xlu0 %676 }
 0x23e   : > { %v633_v28 = vsel %vm530_vm3, %v628_v27, 0  ;;  %v682_v30 = vsel %vm530_vm3, %v677_v29, 0 }
 0x23f   : > { %1533 = vmatpush3.bf16.xpose.msra.mxu1 %v633_v28 }
 0x240   : > { %1544 = vmatprep.subr.bf16.mxu1 %v1885_v2 }
 0x242   : > { %1529 = vmatmul.mubr.msk.bf16.vlgmr.msra.gmra.mrb[4].mxu0 %vm530_vm3, %v2165_v19 }
 0x243   : > { %1539 = vmatpush3.bf16.xpose.msra.mxu0 %v682_v30  ;;  %1540 = vmatprep.mubr.msk.bf16.mxu0 %vm1886_vm1, %v1885_v2 }
 0x244   : > { %1550 = vmatprep.subr.bf16.mxu0 %v1885_v2 }
 0x246   : > { %1535 = vmatmul.mubr.msk.bf16.vlgmr.msra.gmra.mrb[4].mxu1 %vm530_vm3, %v2170_v23 }
 0x247   : > { %1546 = vmatprep.mubr.msk.bf16.mxu1 %vm1886_vm1, %v1885_v2 }
 0x24a   : > { %1541 = vmatmul.mubr.msk.bf16.vlgmr.msra.gmra.mrb[8].mxu0 %vm530_vm3, %v2168_v22 }
 0x24b   : > { %1552 = vmatprep.mubr.msk.bf16.mxu0 %vm1886_vm1, %v1885_v2 }
 0x2a4   : > { %v571_v31 = vpop.f32.mrb[0].mxu1 }
 0x2a5   : > { %v724_v33 = vmul.f32 0.35355338, %v571_v31  ;;  %v1524_v34 = vpop.f32.mrb[1].mxu1 }
 0x2a6   : > { %v574_v35 = vpop.f32.mrb[2].mxu1 }
 0x2a7   : > { %v1525_v36 = vpop.f32.mrb[3].mxu1  ;;  %v734_v37 = vadd.f32 %v1458_v32, %v724_v33 }
 0x2a9   : > { %v738_v38 = vsel %vm530_vm3, %v734_v37, -inf }
 0x2aa   : > { %739 = vmax.xlane.f32.xlu1 %v738_v38 }
 0x315   : > { %v620_v39 = vpop.f32.mrb[4].mxu0 }
 0x316   : > { %v725_v40 = vmul.f32 0.35355338, %v620_v39  ;;  %v1530_v41 = vpop.f32.mrb[5].mxu0 }
 0x317   : > { %v623_v42 = vpop.f32.mrb[6].mxu0 }
 0x318   : > { %v1531_v43 = vpop.f32.mrb[7].mxu0  ;;  %v735_v44 = vadd.f32 %v1458_v32, %v725_v40 }
 0x319   : > { %v669_v45 = vpop.f32.mrb[4].mxu1 }
 0x31a   : > { %v726_v46 = vmul.f32 0.35355338, %v669_v45  ;;  %v1536_v47 = vpop.f32.mrb[5].mxu1  ;;  %v741_v48 = vsel %vm530_vm3, %v735_v44, -inf }
 0x31b   : > { %v672_v49 = vpop.f32.mrb[6].mxu1  ;;  %742 = vmax.xlane.f32.xlu0 %v741_v48  ;;  %v1691_v48 = vld [vmem:[%s2121_s23] sm:$0xff]  }
 0x31c   : > { %v1537_v50 = vpop.f32.mrb[7].mxu1  ;;  %v736_v51 = vadd.f32 %v1458_v32, %v726_v46  ;;  %v1692_v49 = vld [vmem:[%s2121_s23 + $0x8] sm:$0xff]  }
 0x31d   : > { %v718_v52 = vpop.f32.mrb[8].mxu0 }
 0x31e   : > { %v727_v53 = vmul.f32 0.35355338, %v718_v52  ;;  %v1542_v54 = vpop.f32.mrb[9].mxu0  ;;  %v744_v55 = vsel %vm530_vm3, %v736_v51, -inf }
 0x31f   : > { %745 = vmax.xlane.f32.xlu0 %v744_v55  ;;  %v721_v56 = vpop.f32.mrb[10].mxu0 }
 0x320   : > { %v1543_v57 = vpop.f32.mrb[11].mxu0  ;;  %v737_v58 = vadd.f32 %v1458_v32, %v727_v53 }
 0x322   : > { %v747_v59 = vsel %vm530_vm3, %v737_v58, -inf }
 0x323   : > { %748 = vmax.xlane.f32.xlu1 %v747_v59 }
 0x334   : > { %835 = vrot.lane.b32.xlu1 %v2165_v19, %s1891_s20 }
 0x335   : > { %786 = vrot.lane.b32.xlu0 %v2162_v16, %s1891_s20 }
 0x337   : > { %v740_v60 = vpop.xlane.xlu1 %739 }
 0x338   : > { %v750_v61 = vsub.f32 %v734_v37, %v740_v60 }
 0x33a   : > { %v754_v62 = vmul.f32 1.442695, %v750_v61 }
 0x33c   : > { %1699 = vpow2.f32 %v754_v62 }
 0x346   : > { %v1700_v63 = vpop.eup %1699 }
 0x347   : > { %v762_v0 = vsel %vm530_vm3, %v1700_v63, 0.0 }
 0x354   : > { %763 = vadd.xlane.f32.xlu0 %v762_v0 }
 0x3a8   : > { %v743_v1 = vpop.xlane.xlu0 %742 }
 0x3a9   : > { %v751_v3 = vsub.f32 %v735_v44, %v743_v1 }
 0x3ab   : > { %v756_v5 = vmul.f32 1.442695, %v751_v3 }
 0x3ac   : > { %v746_v6 = vpop.xlane.xlu0 %745 }
 0x3ad   : > { %1701 = vpow2.f32 %v756_v5  ;;  %v752_v8 = vsub.f32 %v736_v51, %v746_v6 }
 0x3af   : > { %v758_v10 = vmul.f32 1.442695, %v752_v8  ;;  %v1003_v8 = vsub.s32 1, %v2156_v7 }
 0x3b0   : > { %v787_v11 = vpop.permute.xlu0 %786  ;;  %v749_v12 = vpop.xlane.xlu1 %748 }
 0x3b1   : > { %1703 = vpow2.f32 %v758_v10  ;;  %v793_v13 = vsel %vm791_vm4, %v787_v11, 0  ;;  %v753_v14 = vsub.f32 %v737_v58, %v749_v12  ;;  %v1004_v10 = vrot.slane %v2159_v9, %v1003_v8 }
 0x3b2   : > { %1545 = vmatpush3.bf16.msra.mxu1 %v793_v13 }
 0x3b3   : > { %v760_v15 = vmul.f32 1.442695, %v753_v14  ;;  %1556 = vmatprep.subr.bf16.mxu1 %v1885_v2 }
 0x3b4   : > { %v836_v16 = vpop.permute.xlu1 %835 }
 0x3b5   : > { %1705 = vpow2.f32 %v760_v15  ;;  %v841_v17 = vsel %vm791_vm4, %v836_v16, 0 }
 0x3b6   : > { %1551 = vmatpush3.bf16.msra.mxu0 %v841_v17 }
 0x3b7   : > { %v1702_v18 = vpop.eup %1701  ;;  %1562 = vmatprep.subr.bf16.mxu0 %v1885_v2 }
 0x3b8   : > { %v765_v19 = vsel %vm530_vm3, %v1702_v18, 0.0 }
 0x3b9   : > { %766 = vadd.xlane.f32.xlu1 %v765_v19 }
 0x3bb   : > { %v1704_v20 = vpop.eup %1703 }
 0x3bc   : > { %v768_v21 = vsel %vm530_vm3, %v1704_v20, 0.0 }
 0x3bd   : > { %769 = vadd.xlane.f32.xlu0 %v768_v21 }
 0x3bf   : > { %v1706_v24 = vpop.eup %1705 }
 0x3c0   : > { %v771_v25 = vsel %vm530_vm3, %v1706_v24, 0.0 }
 0x3c1   : > { %772 = vadd.xlane.f32.xlu1 %v771_v25  ;;  %v1693_v25 = vld [vmem:[%s2126_s15] sm:$0xff]  }
 0x3d2   : > { %883 = vrot.lane.b32.xlu1 %v2170_v23, %s1891_s20 }
 0x3d3   : > { %931 = vrot.lane.b32.xlu0 %v2168_v22, %s1891_s20 }
 0x3e1   : > { %v764_v26 = vpop.xlane.xlu0 %763 }
 0x3e2   : > { %1707 = vrcp.f32 %v764_v26  ;;  %v1694_v26 = vld [vmem:[%s2126_s15 + $0x8] sm:$0xff]  }
 0x3ec   : > { %v1708_v27 = vpop.eup %1707 }
 0x3ed   : > { %v778_v28 = vmul.f32 %v1708_v27, %v1700_v63  ;;  %v1695_v27 = vld [vmem:[%s2131_s26] sm:$0xff]  }
 0x3ef   : > { %v782_v29 = vpack.c.bf16 %v778_v28, %v778_v28 }
 0x3f1   : > { %1547 = vmatmul.mubr.msk.bf16.vlgmr.msra.gmra.mrb[8].mxu1 %vm530_vm3, %v782_v29 }
 0x3f2   : > { %1558 = vmatprep.mubr.msk.bf16.mxu1 %vm1886_vm1, %v1885_v2 }
 0x446   : > { %v767_v30 = vpop.xlane.xlu1 %766 }
 0x447   : > { %1709 = vrcp.f32 %v767_v30 }
 0x44a   : > { %v770_v31 = vpop.xlane.xlu0 %769 }
 0x44b   : > { %1711 = vrcp.f32 %v770_v31  ;;  %v1077_v31 = vsub.s32 2, %v2156_v7 }
 0x44e   : > { %v773_v32 = vpop.xlane.xlu1 %772  ;;  %v932_v22 = vpop.permute.xlu0 %931 }
 0x44f   : > { %1713 = vrcp.f32 %v773_v32  ;;  %v937_v39 = vsel %vm791_vm4, %v932_v22, 0  ;;  %v1082_v32 = vsub.s32 3, %v2156_v7 }
 0x451   : > { %v1710_v23 = vpop.eup %1709  ;;  %v1083_v22 = vrot.slane %v2159_v9, %v1082_v32 }
 0x452   : > { %v779_v33 = vmul.f32 %v1710_v23, %v1702_v18  ;;  %v884_v34 = vpop.permute.xlu1 %883  ;;  %v1078_v23 = vrot.slane %v2159_v9, %v1077_v31 }
 0x453   : > { %v889_v35 = vsel %vm791_vm4, %v884_v34, 0 }
 0x454   : > { %1557 = vmatpush3.bf16.msra.mxu1 %v889_v35  ;;  %v783_v36 = vpack.c.bf16 %v779_v33, %v779_v33 }
 0x455   : > { %v1712_v37 = vpop.eup %1711  ;;  %1568 = vmatprep.subr.bf16.mxu1 %v1885_v2 }
 0x456   : > { %v780_v38 = vmul.f32 %v1712_v37, %v1704_v20  ;;  %1553 = vmatmul.mubr.msk.bf16.vlgmr.msra.gmra.mrb[12].mxu0 %vm530_vm3, %v783_v36 }
 0x457   : > { %1563 = vmatpush3.bf16.msra.mxu0 %v937_v39  ;;  %1564 = vmatprep.mubr.msk.bf16.mxu0 %vm1886_vm1, %v1885_v2  ;;  %v1698_v39 = vld [vmem:[%s2131_s26 + $0x18] sm:$0xff]  }
 0x458   : > { %v784_v40 = vpack.c.bf16 %v780_v38, %v780_v38  ;;  %1576 = vmatprep.subr.bf16.mxu0 %v1885_v2  ;;  %v1697_v38 = vld [vmem:[%s2131_s26 + $0x10] sm:$0xff]  }
 0x459   : > { %v1714_v41 = vpop.eup %1713 }
 0x45a   : > { %v781_v42 = vmul.f32 %v1714_v41, %v1706_v24  ;;  %1559 = vmatmul.mubr.msk.bf16.vlgmr.msra.gmra.mrb[12].mxu1 %vm530_vm3, %v784_v40  ;;  %v1092_v40 = vsub.s32 4, %v2156_v7 }
 0x45b   : > { %1572 = vmatprep.mubr.msk.bf16.mxu1 %vm1886_vm1, %v1885_v2  ;;  %1569 = vmatpush3.bf16.msra.mxu1 %v1691_v48 }
 0x45c   : > { %v785_v43 = vpack.c.bf16 %v781_v42, %v781_v42  ;;  %1570 = vmatprep.subr.bf16.mxu1 %v1885_v2  ;;  %v1093_v41 = vrot.slane %v2159_v9, %v1092_v40 }
 0x45e   : > { %1565 = vmatmul.mubr.msk.bf16.vlgmr.msra.gmra.mrb[16].mxu0 %vm530_vm3, %v785_v43 }
 0x45f   : > { %1580 = vmatprep.mubr.msk.bf16.mxu0 %vm1886_vm1, %v1885_v2  ;;  %1571 = vmatpush3.bf16.msra.mxu1 %v1692_v49  ;;  %v1161_v49 = vsub.s32 5, %v2156_v7 }
 0x460   : > { %1584 = vmatprep.subr.bf16.mxu1 %v1885_v2  ;;  %1577 = vmatpush3.bf16.msra.mxu0 %v1693_v25 }
 0x461   : > { %1578 = vmatprep.subr.bf16.mxu0 %v1885_v2 }
 0x464   : > { %1579 = vmatpush3.bf16.msra.mxu0 %v1694_v26 }
 0x4c4   : > { %v829_v44 = vpop.f32.mrb[8].mxu1 }
 0x4c5   : > { %v1548_v45 = vpop.f32.mrb[9].mxu1 }
 0x4c6   : > { %v832_v46 = vpop.f32.mrb[10].mxu1 }
 0x4c7   : > { %v1549_v47 = vpop.f32.mrb[11].mxu1 }
 0x529   : > { %v877_v50 = vpop.f32.mrb[12].mxu0 }
 0x52a   : > { %980 = vrot.lane.b32.xlu1 %v877_v50, %s1892_s9  ;;  %v1554_v51 = vpop.f32.mrb[13].mxu0  ;;  %v1162_v50 = vrot.slane %v2159_v9, %v1161_v49 }
 0x52b   : > { %v880_v52 = vpop.f32.mrb[14].mxu0 }
 0x52c   : > { %v1555_v53 = vpop.f32.mrb[15].mxu0 }
 0x52d   : > { %v925_v54 = vpop.f32.mrb[12].mxu1 }
 0x52e   : > { %984 = vrot.lane.b32.xlu0 %v925_v54, %s1893_s0  ;;  %v1560_v55 = vpop.f32.mrb[13].mxu1 }
 0x52f   : > { %v928_v56 = vpop.f32.mrb[14].mxu1 }
 0x530   : > { %v1561_v57 = vpop.f32.mrb[15].mxu1 }
 0x531   : > { %v973_v58 = vpop.f32.mrb[16].mxu0 }
 0x532   : > { %988 = vrot.lane.b32.xlu1 %v973_v58, %s1894_s11  ;;  %v1566_v59 = vpop.f32.mrb[17].mxu0 }
 0x533   : > { %v976_v60 = vpop.f32.mrb[18].mxu0 }
 0x534   : > { %v1567_v61 = vpop.f32.mrb[19].mxu0 }
 0x59c   : > { %v981_v62 = vpop.permute.xlu1 %980 }
 0x59d   : > { %v991_v0 = vsel %vm530_vm3, %v829_v44, %v981_v62 }
 0x5a0   : > { %v985_v63 = vpop.permute.xlu0 %984 }
 0x5a1   : > { %v993_v1 = vsel %vm992_vm5, %v991_v0, %v985_v63 }
 0x5a4   : > { %v989_v3 = vpop.permute.xlu1 %988 }
 0x5a5   : > { %v995_v5 = vsel %vm994_vm6, %v993_v1, %v989_v3  ;;  %v1247_v1 = vsub.s32 6, %v2156_v7  ;;  %v1252_v3 = vsub.s32 7, %v2156_v7 }
 0x5a6   : > { %v996_v6 = vpack.c.bf16 %v995_v5, %v995_v5 }
 0x5a7   : > { %v1248_v5 = vrot.slane %v2159_v9, %v1247_v1 }
 0x5a8   : > { %1573 = vmatmul.mubr.msk.bf16.vlgmr.msra.gmra.mrb[16].mxu1 %vm469_vm2, %v996_v6 }
 0x5a9   : > { %1592 = vmatprep.mubr.msk.bf16.mxu1 %vm1886_vm1, %v1885_v2  ;;  %1585 = vmatpush3.bf16.msra.mxu1 %v1695_v27 }
 0x5aa   : > { %1586 = vmatprep.subr.bf16.mxu1 %v1885_v2 }
 0x67b   : > { %v1054_v11 = vpop.f32.mrb[16].mxu1 }
 0x67c   : > { %v1055_v12 = vadd.f32 %v1054_v11, %v1004_v10  ;;  %v1574_v13 = vpop.f32.mrb[17].mxu1  ;;  %v1253_v10 = vrot.slane %v2159_v9, %v1252_v3 }
 0x67d   : > { %v1057_v14 = vpop.f32.mrb[18].mxu1 }
 0x67e   : > { %v1575_v15 = vpop.f32.mrb[19].mxu1  ;;  %v1060_v16 = vadd.f32 %v1055_v12, %v2145_v4  ;;  %v1696_v4 = vld [vmem:[%s2131_s26 + $0x8] sm:$0xff]   ;;  %s1475_s26 = sshll.u32 %s1869_s28, 7  ;;  %s1895_s28 = smov [#allocation7]  }
 0x67f   : > { %1587 = vmatpush3.bf16.msra.mxu1 %v1696_v4  ;;  %s2279_s13 = scalar_lea.hbm %s2342_s7, %s1475_s26  ;;  %s1783_s23 = sshll.u32 %s1895_s28, 4  ;;  %s1784_s23 = int_to_ptr.vmem [resolvable:$false] %s1783_s23 }
 0x680   : > { %v1061_v17 = vsel %vm469_vm2, %v1060_v16, 0.0  ;;  %1588 = vmatprep.subr.bf16.mxu1 %v1885_v2  ;;  %s1785_s15 = scalar_lea.vmem %s1784_s23, 256  ;;  %p1786_p1 = scmp.lt.s32.totalorder %s2281_s21, %s1784_s23 }
 0x681   : > { %1062 = vadd.xlane.f32.xlu0 %v1061_v17  ;;  %p1787_p2 = scmp.lt.s32.totalorder %s1785_s15, %s1779_s22 }
 0x683   : > { %1589 = vmatpush3.bf16.msra.mxu1 %v1697_v38  ;;  %p1788_p10 = por %p1787_p2, %p1786_p1 }
 0x684   : > { %1590 = vmatprep.subr.bf16.mxu1 %v1885_v2 }
 0x685   : > { %p1789_p11 = pnand %p1788_p10, %p1782_p12 }
 0x687   : > { %1591 = vmatpush3.bf16.msra.mxu1 %v1698_v39 }
 0x70e   : > { %v1063_v18 = vpop.xlane.xlu0 %1062 }
 0x70f   : > { %v1065_v19 = vmul.f32 0.03125, %v1063_v18 }
 0x711   : > { %v1066_v20 = vsub.f32 %v1060_v16, %v1065_v19 }
 0x713   : > { %v1067_v21 = vmul.f32 %v1066_v20, %v1066_v20 }
 0x715   : > { %v1068_v24 = vsel %vm469_vm2, %v1067_v21, 0.0 }
 0x716   : > { %1069 = vadd.xlane.f32.xlu1 %v1068_v24 }
 0x7a3   : > { %v1070_v28 = vpop.xlane.xlu1 %1069 }
 0x7a4   : > { %v1071_v29 = vmul.f32 0.03125, %v1070_v28 }
 0x7a6   : > { %v1072_v30 = vadd.f32 1e-05, %v1071_v29 }
 0x7a8   : > { %1715 = vrsqrt.f32 %v1072_v30 }
 0x7b2   : > { %v1716_v33 = vpop.eup %1715 }
 0x7b3   : > { %v1074_v34 = vmul.f32 %v1716_v33, %v1066_v20 }
 0x7b5   : > { %v1079_v35 = vmul.f32 %v1078_v23, %v1074_v34 }
 0x7b7   : > { %v1084_v36 = vadd.f32 %v1083_v22, %v1079_v35 }
 0x7b9   : > { %v1085_v37 = vpack.c.bf16 %v1084_v36, %v1084_v36 }
 0x7bb   : > { %1581 = vmatmul.mubr.msk.bf16.vlgmr.msra.gmra.mrb[20].mxu0 %vm469_vm2, %v1085_v37 }
 0x88e   : > { %v1143_v42 = vpop.f32.mrb[20].mxu0 }
 0x88f   : > { %v1144_v43 = vadd.f32 %v1143_v42, %v1093_v41  ;;  %v1582_v44 = vpop.f32.mrb[21].mxu0 }
 0x890   : > { %v1146_v45 = vpop.f32.mrb[22].mxu0 }
 0x891   : > { %v1149_v46 = vmax.f32 %v1144_v43, 0.0  ;;  %v1583_v47 = vpop.f32.mrb[23].mxu0 }
 0x893   : > { %v1150_v48 = vpack.c.bf16 %v1149_v46, %v1149_v46 }
 0x895   : > { %1593 = vmatmul.mubr.msk.bf16.vlgmr.msra.gmra.mrb[20].mxu1 %vm1187_vm7, %v1150_v48 }
 0x968   : > { %v1225_v2 = vpop.f32.mrb[20].mxu1 }
 0x969   : > { %v1226_v51 = vadd.f32 %v1225_v2, %v1162_v50  ;;  %v1594_v52 = vpop.f32.mrb[21].mxu1 }
 0x96a   : > { %v1228_v53 = vpop.f32.mrb[22].mxu1 }
 0x96b   : > { %v1595_v54 = vpop.f32.mrb[23].mxu1  ;;  %v1231_v55 = vadd.f32 %v1226_v51, %v1084_v36 }
 0x96d   : > { %v1232_v56 = vsel %vm469_vm2, %v1231_v55, 0.0 }
 0x96e   : > { %1233 = vadd.xlane.f32.xlu0 %v1232_v56 }
 0x9fb   : > { %v1234_v57 = vpop.xlane.xlu0 %1233 }
 0x9fc   : > { %v1235_v58 = vmul.f32 0.03125, %v1234_v57 }
 0x9fe   : > { %v1236_v59 = vsub.f32 %v1231_v55, %v1235_v58 }
 0xa00   : > { %v1237_v60 = vmul.f32 %v1236_v59, %v1236_v59 }
 0xa02   : > { %v1238_v61 = vsel %vm469_vm2, %v1237_v60, 0.0 }
 0xa03   : > { %1239 = vadd.xlane.f32.xlu0 %v1238_v61 }
 0xa90   : > { %v1240_v62 = vpop.xlane.xlu0 %1239 }
 0xa91   : > { %v1241_v63 = vmul.f32 0.03125, %v1240_v62 }
 0xa93   : > { %v1242_v0 = vadd.f32 1e-05, %v1241_v63 }
 0xa95   : > { %1717 = vrsqrt.f32 %v1242_v0 }
 0xa9f   : > { %v1718_v6 = vpop.eup %1717 }
 0xaa0   : > { %v1244_v8 = vmul.f32 %v1718_v6, %v1236_v59 }
 0xaa2   : > { %v1249_v11 = vmul.f32 %v1248_v5, %v1244_v8 }
 0xaa4   : > { %v1254_v12 = vadd.f32 %v1253_v10, %v1249_v11 }
 0xaa6   : > { %1255 = vst.msk [vmem:[%s2136_s19] sm:$0xff] %vm469_vm2, %v1254_v12 }
 0xaa7   : > { %1792 = shalt.err (!%p1789_p11)
}
 0xaa8   : > { %s1793_s30 = scalar_lea.hbm %s2279_s13, 128  ;;  %s1797_s19 = scalar_lea.hbm %s2342_s7, 256 }
 0xaa9   : > { %p1794_p4 = scmp.ne.s32.totalorder %s2279_s13, %s1793_s30  ;;  %p1798_p5 = scmp.lt.u32.totalorder %s2279_s13, %s2342_s7 }
 0xaaa   : > { %p1799_p9 = scmp.lt.u32.totalorder %s1797_s19, %s1793_s30  ;;  %p1801_p7 = scmp.lt.u32.totalorder %s1793_s30, %s2279_s13 }
 0xaab   : > { %p1795_p6 = pnand %p1794_p4, %p2377_p3 }
 0xaac   : > { %p1800_p0 = por %p1799_p9, %p1798_p5 }
 0xaad   : > { %p1796_p13 = pneg %p1795_p6 }
 0xaae   : > { %p1802_p8 = por %p1801_p7, %p1800_p0 }
 0xab0   : > { %p1803_p12 = pnand %p1802_p8, %p1796_p13 }
 0xab2   : > { %1806 = shalt.err (!%p1803_p12)
}
 0xab3   : > { %1600 = dma.vmem_to_hbm [thread:$0]  (%p2377_p3), %s2281_s21, 128, %s2279_s13, %s1257_s29  }
 0xab4 PF: > { %s2378_s25 = sld [smem:[#allocation11_spill]]  ;;  %s2379_s27 = sld [smem:[#allocation18_spill]] }
 0xab5   : > { %p1614_p1 = scmp.ge.s32.totalorder %s1881_s8, 2 }
 0xaba   : > { %s1282_s18 = sand.u32 1, %s2378_s25   ;;  %p2380_p2 = scmp.ne.s32.totalorder %s2379_s27, 0 }
 0xabb   : > { %s1283_s20 = scalar_lea.sflag [#allocation4], %s1282_s18 }
 0xabc   : > { %p1610_p10 = pnand %p1614_p1, %p2380_p2 }
 0xabe   : > { %1848 = dma.done.wait (!%p1610_p10), %s1283_s20, 128  }
 0xabf   : > { %1850 = vsyncadd (!%p1610_p10), %s1283_s20, 4294967168  ;;  %s26_s8 = sadd.s32 1, %s1881_s8   ;;  %s2381_s24 = sld [smem:[#allocation12_spill]] }
 0xac0   : > { %p23_p11 = scmp.ge.s32.totalorder %s26_s8, 6   ;;  %s2382_s25 = sld [smem:[#allocation13_spill]] }
 0xac1   : > { %s2383_s26 = sld [smem:[#allocation19_spill]]  ;;  %s2384_s27 = sld [smem:[#allocation14_spill]] }
 0xac2   : > { %s2385_s28 = sld [smem:[#allocation15_spill]]  ;;  %s2386_s29 = sld [smem:[#allocation16_spill]] }
 0xac3   : > { %s2387_s30 = sld [smem:[#allocation17_spill]]  ;;  %25 = sbr.rel (!%p23_p11) target bundleno = 12 (0xc), region = 125 }
 0xaca   :  { %1288 = vsyncpa [#allocation3], 1 }
 0xacb   :  { %1290 = vsyncpa [#allocation3 + $0x1], 1 }
 0xacc   :  { %1291 = vsyncpa [#allocation6], 1 }
 0xacd   :  { %1293 = vsyncpa [#allocation6 + $0x1], 1 }
 0xace   :  { %1294 = vsyncpa [#allocation4], 1 }
 0xacf   :  { %1296 = vsyncpa [#allocation4 + $0x1], 1 }

</bundles_post_ra>
